<compile_context>
chip_gen: v7x
topology: tpu7x:2x2x1
jax: 0.10.0
libtpu: 0.0.40
codegen_flags: <defaults>
</compile_context>

<pallas_src>
import jax
import jax.numpy as jnp
from jax.experimental import pallas as pl
from jax.experimental.pallas import tpu as pltpu

HIDDEN = 32
VOCAB = 128
MAX_POS = 64
TYPE_VOCAB = 2
NUM_LAYERS = 2
LN_EPS = 1e-12  # BertLayerNorm default eps


def _round_up(x, m):
    return (x + m - 1) // m * m


def _cdiv(a, b):
    return -(-a // b)


# ----------------------------------------------------------------------------
# Fused kernel: single 3-hot MXU gather (word+pos+tok) + LayerNorm
# ----------------------------------------------------------------------------
def _embed_gather_ln_kernel(ids_ref, table_ref, gamma_ref, beta_ref, out_ref):
    tile = ids_ref.shape[0]
    kdim = table_ref.shape[0]          # 256 (VOCAB + MAX_POS + TYPE_VOCAB padded)

    # Offsets were pre-added in the wrapper: col0 = wid, col1 = pid + VOCAB,
    # col2 = tid + VOCAB + MAX_POS, col3 = -1 (pad, never matches).
    wid = ids_ref[:, 0:1]              # (tile, 1) int32
    pid = ids_ref[:, 1:2]
    tid = ids_ref[:, 2:3]

    # One combined 3-hot row per token against a single iota; the id ranges are
    # disjoint ([0,128), [128,192), [192,194)), so OR == exact 3-hot.
    iota = jax.lax.broadcasted_iota(jnp.int32, (tile, kdim), 1)
    hot = (wid == iota) | (pid == iota) | (tid == iota)
    onehot = hot.astype(table_ref.dtype)                     # (tile, 256)

    # Single MXU push, K=256: result is already word + pos + tok (f32 accum).
    x = jnp.dot(onehot, table_ref[...],
                preferred_element_type=jnp.float32)          # (tile, H)

    # LayerNorm (all f32; dropout is identity in eval mode).
    mean = jnp.mean(x, axis=-1, keepdims=True)
    xc = x - mean
    var = jnp.mean(xc * xc, axis=-1, keepdims=True)
    inv = jax.lax.rsqrt(var + LN_EPS)
    # TODO(synk): lane-dense packed store ((tile,32)->(tile//4,128)) could remove
    # masked vst's, but the repack crosses an (8,128) tile boundary; left out
    # pending a bundle-dump check that masked stores are actually the binding slot.
    out_ref[...] = (xc * inv * gamma_ref[...] + beta_ref[...]).astype(out_ref.dtype)


def _choose_tile(n, max_tile, min_grid):
    """Balanced row tile (multiple of 8), grid >= min_grid when possible."""
    n8 = _round_up(max(n, 1), 8)
    steps = max(min_grid, _cdiv(n8, max_tile))
    steps = max(1, min(steps, n8 // 8))          # never below 8-row tiles
    tile = _round_up(_cdiv(n8, steps), 8)
    steps = _cdiv(n8, tile)
    return tile, tile * steps


def embed_gather_layernorm(word_ids, pos_ids, tok_ids, params, *,
                           max_tile=2048, min_grid=2,
                           out_dtype=jnp.float32, table_dtype=jnp.float32):
    """word_ids/pos_ids/tok_ids: flat (n,) int arrays. Returns (n, H) embeddings."""
    n = int(word_ids.shape[0])
    h = params["word_emb"].shape[1]

    tile, n_pad = _choose_tile(n, max_tile, min_grid)

    # Concatenated embedding table: rows [0,128)=word, [128,192)=pos,
    # [192,194)=token-type, rest zero padding (to a multiple of 256 = MXU depth).
    table = jnp.concatenate(
        [params["word_emb"].astype(jnp.float32),
         params["pos_emb"].astype(jnp.float32),
         params["tok_emb"].astype(jnp.float32)], axis=0)
    k_pad = _round_up(table.shape[0], 256)
    table = jnp.pad(table, ((0, k_pad - table.shape[0]), (0, 0))).astype(table_dtype)

    # Single packed id array: one DMA stream instead of three 1-lane streams.
    # TODO(synk): for the default arange position_ids, pos could be reconstructed
    #             in-kernel from program_id*tile + row iota, dropping a column.
    # TODO(synk): out-of-range ids gather an all-zero row (torch would raise);
    #             add a checkify assert here if inputs are not guaranteed in range.
    ids = jnp.stack(
        [word_ids.astype(jnp.int32),
         pos_ids.astype(jnp.int32) + VOCAB,
         tok_ids.astype(jnp.int32) + VOCAB + MAX_POS,
         jnp.full((n,), -1, jnp.int32)], axis=-1)           # (n, 4)
    if n_pad != n:
        ids = jnp.pad(ids, ((0, n_pad - n), (0, 0)), constant_values=-1)

    gamma = params["ln_gamma"].astype(jnp.float32).reshape(1, h)
    beta = params["ln_beta"].astype(jnp.float32).reshape(1, h)

    ids_spec = pl.BlockSpec((tile, 4), lambda i: (i, 0))
    out_spec = pl.BlockSpec((tile, h), lambda i: (i, 0))

    def resident_spec(a):
        # Full-array block with a constant index_map: DMA hoisted, stays in VMEM.
        return pl.BlockSpec(a.shape, lambda i: (0, 0))

    out = pl.pallas_call(
        _embed_gather_ln_kernel,
        out_shape=jax.ShapeDtypeStruct((n_pad, h), out_dtype),
        grid_spec=pltpu.PrefetchScalarGridSpec(
            num_scalar_prefetch=0,
            grid=(n_pad // tile,),
            in_specs=[ids_spec, resident_spec(table),
                      resident_spec(gamma), resident_spec(beta)],
            out_specs=out_spec,
        ),
        compiler_params=pltpu.CompilerParams(
            dimension_semantics=("parallel",)),   # v7x: rows split across 2 TCs
    )(ids, table, gamma, beta)

    return out[:n]


# ----------------------------------------------------------------------------
# BertModelInit.forward equivalent
# ----------------------------------------------------------------------------
def bert_model_init_forward(params, input_ids, attention_mask=None,
                            token_type_ids=None, position_ids=None):
    b, s = input_ids.shape
    if attention_mask is None:
        attention_mask = jnp.ones((b, s), dtype=jnp.float32)
    if token_type_ids is None:
        # embeddings.token_type_ids buffer is all zeros in HF BERT
        token_type_ids = jnp.zeros((b, s), dtype=jnp.int32)
    if position_ids is None:
        position_ids = jnp.broadcast_to(
            jnp.arange(s, dtype=jnp.int32)[None, :], (b, s))

    # Fused Pallas kernel: in-VMEM 3-hot gather + sum + LayerNorm (dropout = id).
    emb = embed_gather_layernorm(
        input_ids.reshape(-1),
        position_ids.reshape(-1),
        token_type_ids.reshape(-1),
        params)
    embedding_output = emb.reshape(b, s, HIDDEN)

    # Extended attention mask: (1 - mask[:, None, None, :]) * -10000.
    # Kept in plain jnp per perf review: trivial (B*S)-element multiply-add,
    # last dim S << 128 lanes; a pallas_call launch + HBM round-trip would
    # dominate its cost, and XLA fuses this into neighbouring ops anyway.
    ext_mask = (1.0 - attention_mask.astype(jnp.float32))[:, None, None, :] * -10000.0

    # get_head_mask(None, num_hidden_layers) -> [None] * num_hidden_layers
    head_mask = [None] * NUM_LAYERS
    # TODO(synk): decoder cross-attention mask path (invert_attention_mask) and
    # past_key_values handling skipped — config.is_decoder=False here.

    encoder_hidden_states = None
    encoder_extended_attention_mask = None
    past_key_values = None
    use_cache = False            # not a decoder
    output_attentions = False
    output_hidden_states = False
    return_dict = True

    return [embedding_output, ext_mask, head_mask, encoder_hidden_states,
            encoder_extended_attention_mask, past_key_values, use_cache,
            output_attentions, output_hidden_states, return_dict]


# ----------------------------------------------------------------------------
# Pure-JAX reference (for correctness check only)
# ----------------------------------------------------------------------------
def _ref_embedding(params, input_ids, position_ids, token_type_ids):
    x = (params["word_emb"][input_ids]
         + params["pos_emb"][position_ids]
         + params["tok_emb"][token_type_ids])
    mean = x.mean(-1, keepdims=True)
    xc = x - mean
    var = (xc * xc).mean(-1, keepdims=True)
    return xc * jax.lax.rsqrt(var + LN_EPS) * params["ln_gamma"] + params["ln_beta"]


if __name__ == "__main__":
    key = jax.random.PRNGKey(0)
    k1, k2, k3, k4, k5, k6 = jax.random.split(key, 6)
    params = {
        "word_emb": 0.02 * jax.random.normal(k1, (VOCAB, HIDDEN), jnp.float32),
        "pos_emb": 0.02 * jax.random.normal(k2, (MAX_POS, HIDDEN), jnp.float32),
        "tok_emb": 0.02 * jax.random.normal(k3, (TYPE_VOCAB, HIDDEN), jnp.float32),
        "ln_gamma": 1.0 + 0.1 * jax.random.normal(k4, (HIDDEN,), jnp.float32),
        "ln_beta": 0.1 * jax.random.normal(k5, (HIDDEN,), jnp.float32),
    }

    B, S = 2, 8
    input_ids = jax.random.randint(k6, (B, S), 0, VOCAB, dtype=jnp.int32)

    outputs = bert_model_init_forward(params, input_ids)
    embedding_output, ext_mask = outputs[0], outputs[1]
    jax.block_until_ready(embedding_output)
    jax.block_until_ready(ext_mask)

    assert embedding_output.shape == (B, S, HIDDEN)
    assert ext_mask.shape == (B, 1, 1, S)

    # Correctness vs pure-JAX reference.  An indexing/off-by-one bug in the
    # one-hot gather would produce O(1) post-LayerNorm diffs, so this tolerance
    # (budgeting only MXU f32 pass-decomposition rounding) catches real errors.
    pos_ids = jnp.broadcast_to(jnp.arange(S, dtype=jnp.int32)[None, :], (B, S))
    tok_ids = jnp.zeros((B, S), dtype=jnp.int32)
    ref = _ref_embedding(params, input_ids, pos_ids, tok_ids)
    max_err = float(jnp.max(jnp.abs(embedding_output - ref)))
    assert jnp.allclose(embedding_output, ref, atol=1e-4, rtol=1e-4), max_err

    ref_mask = (1.0 - jnp.ones((B, S), jnp.float32))[:, None, None, :] * -10000.0
    assert jnp.allclose(ext_mask, ref_mask)

    print("KERNEL_OK")
</pallas_src>

<mosaic_0001>
module attributes {stable_mosaic.version = 11 : i64} {
  func.func @_embed_gather_ln_kernel(%arg0: i32, %arg1: memref<8x4xi32, #tpu.memory_space<vmem>>, %arg2: memref<256x32xf32, #tpu.memory_space<vmem>>, %arg3: memref<1x32xf32, #tpu.memory_space<vmem>>, %arg4: memref<1x32xf32, #tpu.memory_space<vmem>>, %arg5: memref<8x32xf32, #tpu.memory_space<vmem>>) attributes {dimension_semantics = [#tpu.dimension_semantics<parallel>], iteration_bounds = array<i64: 2>, scalar_prefetch = 0 : i64, scratch_operands = 0 : i64, tpu.core_type = #tpu.core_type<tc>, window_params = [{transform_indices = @transform_0, window_bounds = array<i64: 8, 4>}, {pipeline_mode = #tpu.pipeline_mode<synchronous>, transform_indices = @transform_1, window_bounds = array<i64: 256, 32>}, {pipeline_mode = #tpu.pipeline_mode<synchronous>, transform_indices = @transform_2, window_bounds = array<i64: 1, 32>}, {pipeline_mode = #tpu.pipeline_mode<synchronous>, transform_indices = @transform_3, window_bounds = array<i64: 1, 32>}, {transform_indices = @transform_4, window_bounds = array<i64: 8, 32>}]} {
    %c0 = arith.constant 0 : index
    %c0_0 = arith.constant 0 : index
    %0 = vector.load %arg1[%c0, %c0_0] : memref<8x4xi32, #tpu.memory_space<vmem>>, vector<8x1xi32>
    %c0_1 = arith.constant 0 : index
    %c1 = arith.constant 1 : index
    %1 = vector.load %arg1[%c0_1, %c1] : memref<8x4xi32, #tpu.memory_space<vmem>>, vector<8x1xi32>
    %c0_2 = arith.constant 0 : index
    %c2 = arith.constant 2 : index
    %2 = vector.load %arg1[%c0_2, %c2] : memref<8x4xi32, #tpu.memory_space<vmem>>, vector<8x1xi32>
    %3 = tpu.iota {dimensions = array<i32: 1>} : vector<8x256xi32>
    %4 = vector.broadcast %0 : vector<8x1xi32> to vector<8x256xi32>
    %5 = arith.cmpi eq, %4, %3 : vector<8x256xi32>
    %6 = vector.broadcast %1 : vector<8x1xi32> to vector<8x256xi32>
    %7 = arith.cmpi eq, %6, %3 : vector<8x256xi32>
    %8 = arith.ori %5, %7 : vector<8x256xi1>
    %9 = vector.broadcast %2 : vector<8x1xi32> to vector<8x256xi32>
    %10 = arith.cmpi eq, %9, %3 : vector<8x256xi32>
    %11 = arith.ori %8, %10 : vector<8x256xi1>
    %12 = arith.extui %11 : vector<8x256xi1> to vector<8x256xi32>
    %13 = arith.sitofp %12 : vector<8x256xi32> to vector<8x256xf32>
    %c0_3 = arith.constant 0 : index
    %c0_4 = arith.constant 0 : index
    %14 = vector.load %arg2[%c0_3, %c0_4] : memref<256x32xf32, #tpu.memory_space<vmem>>, vector<256x32xf32>
    %cst = arith.constant dense<0.000000e+00> : vector<8x32xf32>
    %15 = tpu.matmul %13, %14, %cst {dimension_numbers = #tpu.dot_dimension_numbers<[1], [0], [0], [1], [0, 0, 1, 1], [], []>} : vector<8x256xf32>, vector<256x32xf32>, vector<8x32xf32> -> vector<8x32xf32>
    %cst_5 = arith.constant dense<0.000000e+00> : vector<8xf32>
    %16 = vector.multi_reduction <add>, %15, %cst_5 [1] : vector<8x32xf32> to vector<8xf32>
    %17 = vector.shape_cast %16 : vector<8xf32> to vector<8x1xf32>
    %cst_6 = arith.constant 3.200000e+01 : f32
    %18 = vector.broadcast %cst_6 : f32 to vector<8x1xf32>
    %19 = arith.divf %17, %18 : vector<8x1xf32>
    %20 = vector.broadcast %19 : vector<8x1xf32> to vector<8x32xf32>
    %21 = arith.subf %15, %20 : vector<8x32xf32>
    %22 = arith.mulf %21, %21 : vector<8x32xf32>
    %cst_7 = arith.constant dense<0.000000e+00> : vector<8xf32>
    %23 = vector.multi_reduction <add>, %22, %cst_7 [1] : vector<8x32xf32> to vector<8xf32>
    %24 = vector.shape_cast %23 : vector<8xf32> to vector<8x1xf32>
    %cst_8 = arith.constant 3.200000e+01 : f32
    %25 = vector.broadcast %cst_8 : f32 to vector<8x1xf32>
    %26 = arith.divf %24, %25 : vector<8x1xf32>
    %cst_9 = arith.constant 9.99999996E-13 : f32
    %27 = vector.broadcast %cst_9 : f32 to vector<8x1xf32>
    %28 = arith.addf %26, %27 : vector<8x1xf32>
    %29 = math.rsqrt %28 : vector<8x1xf32>
    %30 = vector.broadcast %29 : vector<8x1xf32> to vector<8x32xf32>
    %31 = arith.mulf %21, %30 : vector<8x32xf32>
    %c0_10 = arith.constant 0 : index
    %c0_11 = arith.constant 0 : index
    %32 = vector.load %arg3[%c0_10, %c0_11] : memref<1x32xf32, #tpu.memory_space<vmem>>, vector<1x32xf32>
    %33 = vector.broadcast %32 : vector<1x32xf32> to vector<8x32xf32>
    %34 = arith.mulf %31, %33 : vector<8x32xf32>
    %c0_12 = arith.constant 0 : index
    %c0_13 = arith.constant 0 : index
    %35 = vector.load %arg4[%c0_12, %c0_13] : memref<1x32xf32, #tpu.memory_space<vmem>>, vector<1x32xf32>
    %36 = vector.broadcast %35 : vector<1x32xf32> to vector<8x32xf32>
    %37 = arith.addf %34, %36 : vector<8x32xf32>
    %c0_14 = arith.constant 0 : index
    %c0_15 = arith.constant 0 : index
    %38 = vector.load %arg5[%c0_14, %c0_15] : memref<8x32xf32, #tpu.memory_space<vmem>>, vector<8x32xf32>
    tpu.vector_store %arg5[%c0_14, %c0_15], %37 {strides = array<i32>} : memref<8x32xf32, #tpu.memory_space<vmem>>, vector<8x32xf32>,
    return
  }
  func.func @transform_0(%arg0: i32) -> (i32, i32) {
    %c0_i32 = arith.constant 0 : i32
    %c0_i32_0 = arith.constant 0 : i32
    return %arg0, %c0_i32 : i32, i32
  }
  func.func @transform_1(%arg0: i32) -> (i32, i32) {
    %c0_i32 = arith.constant 0 : i32
    %c0_i32_0 = arith.constant 0 : i32
    %c0_i32_1 = arith.constant 0 : i32
    return %c0_i32, %c0_i32_0 : i32, i32
  }
  func.func @transform_2(%arg0: i32) -> (i32, i32) {
    %c0_i32 = arith.constant 0 : i32
    %c0_i32_0 = arith.constant 0 : i32
    %c0_i32_1 = arith.constant 0 : i32
    return %c0_i32, %c0_i32_0 : i32, i32
  }
  func.func @transform_3(%arg0: i32) -> (i32, i32) {
    %c0_i32 = arith.constant 0 : i32
    %c0_i32_0 = arith.constant 0 : i32
    %c0_i32_1 = arith.constant 0 : i32
    return %c0_i32, %c0_i32_0 : i32, i32
  }
  func.func @transform_4(%arg0: i32) -> (i32, i32) {
    %c0_i32 = arith.constant 0 : i32
    %c0_i32_0 = arith.constant 0 : i32
    return %arg0, %c0_i32 : i32, i32
  }
}

</mosaic_0001>

<bundles_post_ra>
// kernel: tpu_custom_call.1
= control target key start
LH: loop header
LB: loop body
LE: loop exit
PB: predicated region body
PF: predicated region fallthrough
CT: control target
= control target key end

     0   :  { %9 = vsyncpa [#allocation3], 0  ;;  %s858_s0 = inlined_call_operand.vmem [shape: s32[16,4], index: 0, kind: input, shape index: {}]   ;;  %s859_s1 = inlined_call_operand.vmem [shape: f32[256,32], index: 1, kind: input, shape index: {}]   ;;  %s860_s2 = inlined_call_operand.vmem [shape: f32[1,32], index: 2, kind: input, shape index: {}]   ;;  %s861_s3 = inlined_call_operand.vmem [shape: f32[1,32], index: 3, kind: input, shape index: {}]   ;;  %s862_s4 = inlined_call_operand.hbm [shape: f32[16,32], index: 4, kind: output, shape index: {}]  }
   0x1   :  { %11 = vsyncpa [#allocation3 + $0x1], 0  ;;  %s653_s15 = smov 0   ;;  %s655_s16 = smov 0  }
   0x2   :  { %s657_s17 = smov 0   ;;  %s659_s18 = smov 0  }
   0x3 LB: > { %s674_s19 = sadd.s32 4294967295, %s621_s18   ;;  %s427_s20 = sadd.s32 4294967294, %s621_s18   ;;  %s621_s18 = sphi %s659_s18, %s868_s18   ;;  %s617_s17 = sphi %s657_s17, %s867_s17   ;;  %s613_s16 = sphi %s655_s16, %s866_s16   ;;  %s609_s15 = sphi %s653_s15, %s865_s15  }
   0x4   : > { %s678_s21 = sadd.s32 1, %s621_s18   ;;  %s113_s22 = sadd.s32 1, %s617_s17 }
   0x5   : > { %s110_s23 = ssub.s32 %s621_s18, %s678_s21  ;;  %p123_p0 = scmp.ne.s32.totalorder %s617_s17, %s613_s16 }
   0x6   : > { %p111_p1 = scmp.eq.s32.totalorder %s110_s23, 0  ;;  %p124_p2 = scmp.eq.s32.totalorder %s674_s19, 1 }
   0x7   : > { %p129_p3 = scmp.ne.s32.totalorder %s613_s16, %s609_s15  ;;  %p130_p4 = scmp.eq.s32.totalorder %s427_s20, 1 }
   0x8   : > { %s689_s24 = scalar_select %p111_p1, %s617_s17, %s113_s22  }
   0x9   : > { %p691_p5 = por %p124_p2, %p123_p0  ;;  %p695_p6 = por %p130_p4, %p129_p3 }
   0xa   : > { %p430_p7 = scmp.ge.s32.totalorder %s621_s18, 1  ;;  %p164_p8 = scmp.lt.s32.totalorder %s621_s18, 3 }
   0xc   : > { %p165_p9 = pnand %p430_p7, %p164_p8 }
   0xd   : > { %p189_p10 = scmp.lt.s32.totalorder (!%p165_p9), %s674_s19, 1  ;;  %v236_v0 = vld [vmem:[%s859_s1 + $0x80] sm:$0xff] (!%p165_p9)  ;;  %v237_v1 = vld [vmem:[%s859_s1 + $0x88] sm:$0xff] (!%p165_p9)  ;;  %v623_v2 = vmov (!%p165_p9), 0   ;;  %v624_v3 = vmov (!%p165_p9), 2   ;;  %v238_v7 = vld [vmem:[%s859_s1 + $0x90] sm:$0xff] (!%p165_p9)  ;;  %v194_v52 = vlaneseq (!%p165_p9) }
   0xe   : > { %168 = sbr.rel (%p165_p9) target bundleno = 707 (0x2c3), region = 36  ;;  %553 = vset.pattern.permute.xlu0 (!%p165_p9), %v623_v2  ;;  %555 = vset.pattern.permute.xlu1 (!%p165_p9), %v624_v3  ;;  %v478_v4 = vpack.c.bf16 (!%p165_p9), %v237_v1, %v236_v0  ;;  %v220_v5 = vld [vmem:[%s859_s1] sm:$0xff] (!%p165_p9)  ;;  %v221_v6 = vld [vmem:[%s859_s1 + $0x8] sm:$0xff] (!%p165_p9)  ;;  %v239_v9 = vld [vmem:[%s859_s1 + $0x98] sm:$0xff] (!%p165_p9)  ;;  %v625_v28 = vmov (!%p165_p9), 1   ;;  %v626_v58 = vmov (!%p165_p9), 1.0  }
   0xf   : > { %v480_v8 = vpack.c.bf16 (!%p165_p9), %v221_v6, %v220_v5  ;;  %v222_v10 = vld [vmem:[%s859_s1 + $0x10] sm:$0xff] (!%p165_p9)  ;;  %v223_v11 = vld [vmem:[%s859_s1 + $0x18] sm:$0xff] (!%p165_p9)  ;;  %v482_v12 = vpack.c.bf16 (!%p165_p9), %v239_v9, %v238_v7  ;;  %v240_v13 = vld [vmem:[%s859_s1 + $0xa0] sm:$0xff] (!%p165_p9)  ;;  %v195_v53 = vand.u32 (!%p165_p9), 127, %v194_v52  ;;  %vm322_vm10 = vcmask (!%p165_p9), 261120   ;;  %s186_s28 = sand.u32 (!%p165_p9), 1, %s613_s16  }
  0x10   : > { %479 = vmatprep.subr.bf16.mxu0 (!%p165_p9), %v478_v4  ;;  %v241_v14 = vld [vmem:[%s859_s1 + $0xa8] sm:$0xff] (!%p165_p9)  ;;  %v484_v15 = vpack.c.bf16 (!%p165_p9), %v223_v11, %v222_v10  ;;  %v224_v17 = vld [vmem:[%s859_s1 + $0x20] sm:$0xff] (!%p165_p9)  ;;  %v242_v20 = vld [vmem:[%s859_s1 + $0xb0] sm:$0xff] (!%p165_p9)  ;;  %s431_s29 = sshll.u32 (!%p165_p9), %s186_s28, 3  ;;  %s355_s20 = scalar_lea.sflag (!%p165_p9), [#allocation3], %s186_s28 }
  0x11   : > { %481 = vmatpush3.bf16.msra.mxu0 (!%p165_p9), %v480_v8  ;;  %v486_v16 = vpack.c.bf16 (!%p165_p9), %v241_v14, %v240_v13  ;;  %v225_v18 = vld [vmem:[%s859_s1 + $0x28] sm:$0xff] (!%p165_p9)  ;;  %v243_v21 = vld [vmem:[%s859_s1 + $0xb8] sm:$0xff] (!%p165_p9)  ;;  %v226_v24 = vld [vmem:[%s859_s1 + $0x30] sm:$0xff] (!%p165_p9)  ;;  %v196_v56 = vadd.s32 (!%p165_p9), 128, %v195_v53  ;;  %s188_s9 = scalar_lea.vmem (!%p165_p9), [#allocation2], %s431_s29 }
  0x12   : > { %483 = vmatprep.subr.bf16.mxu0 (!%p165_p9), %v482_v12  ;;  %v488_v22 = vpack.c.bf16 (!%p165_p9), %v225_v18, %v224_v17  ;;  %v490_v23 = vpack.c.bf16 (!%p165_p9), %v243_v21, %v242_v20  ;;  %v227_v25 = vld [vmem:[%s859_s1 + $0x38] sm:$0xff] (!%p165_p9)  ;;  %v244_v26 = vld [vmem:[%s859_s1 + $0xc0] sm:$0xff] (!%p165_p9)  ;;  %v245_v27 = vld [vmem:[%s859_s1 + $0xc8] sm:$0xff] (!%p165_p9)  ;;  %s368_s10 = sshll.u32 (!%p165_p9), %s188_s9, 4  ;;  %s817_s10 = int_to_ptr.vmem [resolvable:$true] %s368_s10 }
  0x13   : > { %v492_v29 = vpack.c.bf16 (!%p165_p9), %v227_v25, %v226_v24  ;;  %v494_v30 = vpack.c.bf16 (!%p165_p9), %v245_v27, %v244_v26  ;;  %v228_v31 = vld [vmem:[%s859_s1 + $0x40] sm:$0xff] (!%p165_p9)  ;;  %v229_v32 = vld [vmem:[%s859_s1 + $0x48] sm:$0xff] (!%p165_p9)  ;;  %v246_v33 = vld [vmem:[%s859_s1 + $0xd0] sm:$0xff] (!%p165_p9) }
  0x14   : > { %v247_v34 = vld [vmem:[%s859_s1 + $0xd8] sm:$0xff] (!%p165_p9)  ;;  %v496_v35 = vpack.c.bf16 (!%p165_p9), %v229_v32, %v228_v31  ;;  %v230_v37 = vld [vmem:[%s859_s1 + $0x50] sm:$0xff] (!%p165_p9)  ;;  %v248_v39 = vld [vmem:[%s859_s1 + $0xe0] sm:$0xff] (!%p165_p9) }
  0x15   : > { %s190_s11 = scalar_select %p189_p10, %s674_s19, 1  ;;  %485 = vmatpush3.bf16.msra.mxu0 %v484_v15  ;;  %v498_v36 = vpack.c.bf16 %v247_v34, %v246_v33  ;;  %v231_v38 = vld [vmem:[%s859_s1 + $0x58] sm:$0xff]  ;;  %v249_v40 = vld [vmem:[%s859_s1 + $0xe8] sm:$0xff]  ;;  %v232_v43 = vld [vmem:[%s859_s1 + $0x60] sm:$0xff] }
  0x16   : > { %487 = vmatprep.subr.bf16.mxu0 %v486_v16  ;;  %v500_v41 = vpack.c.bf16 %v231_v38, %v230_v37  ;;  %v502_v42 = vpack.c.bf16 %v249_v40, %v248_v39  ;;  %v233_v44 = vld [vmem:[%s859_s1 + $0x68] sm:$0xff]  ;;  %v250_v45 = vld [vmem:[%s859_s1 + $0xf0] sm:$0xff]  ;;  %v251_v46 = vld [vmem:[%s859_s1 + $0xf8] sm:$0xff] }
  0x17   : > { %s432_s5 = sshll.u32 %s190_s11, 3  ;;  %v504_v47 = vpack.c.bf16 %v233_v44, %v232_v43  ;;  %v506_v48 = vpack.c.bf16 %v251_v46, %v250_v45  ;;  %v234_v49 = vld [vmem:[%s859_s1 + $0x70] sm:$0xff]  ;;  %v235_v50 = vld [vmem:[%s859_s1 + $0x78] sm:$0xff]  ;;  %v437_v8 = vld [vmem:[%s860_s2] ss:$0 sm:$0xff]  ;;  %s559_s11 = scalar_lea.vmem %s817_s10, 128 }
  0x18   : > { %s192_s8 = scalar_lea.vmem %s858_s0, %s432_s5  ;;  %v508_v51 = vpack.c.bf16 %v235_v50, %v234_v49  ;;  %v438_v10 = vld [vmem:[%s861_s3] ss:$0 sm:$0xff]  ;;  %p560_p11 = scmp.ne.s32.totalorder %s817_s10, %s559_s11 }
  0x19   : > { %v193_v19 = vld [vmem:[%s192_s8] sm:$0xff]  ;;  %489 = vmatpush3.bf16.msra.mxu0 %v488_v22  ;;  %s440_s8 = sshll.u32 %s674_s19, 7  ;;  %s627_s19 = smov [#allocation2]  }
  0x1a   : > { %198 = vperm.xlu0 %553, %v193_v19   ;;  %210 = vperm.xlu1 %555, %v193_v19   ;;  %s815_s14 = scalar_lea.hbm %s862_s4, %s440_s8  ;;  %p561_p12 = pnand %p560_p11, %p691_p5 }
  0x1b   : > { %491 = vmatprep.subr.bf16.mxu0 %v490_v23  ;;  %s563_s22 = sshll.u32 %s627_s19, 4  ;;  %s564_s22 = int_to_ptr.vmem [resolvable:$false] %s563_s22 }
  0x1c   : > { %p562_p13 = pneg %p561_p12  ;;  %s565_s23 = scalar_lea.vmem %s564_s22, 256 }
  0x1d   : > { %493 = vmatpush3.bf16.msra.mxu0 %v492_v29  ;;  %p566_p0 = scmp.lt.s32.totalorder %s817_s10, %s564_s22  ;;  %p567_p1 = scmp.lt.s32.totalorder %s565_s23, %s559_s11 }
  0x1e   : > { %554 = vset.pattern.permute.xlu0 %v625_v28  ;;  %495 = vmatprep.subr.bf16.mxu0 %v494_v30 }
  0x1f   : > { %203 = vperm.xlu0 %554, %v193_v19   ;;  %p568_p2 = por %p567_p1, %p566_p0 }
  0x21   : > { %497 = vmatpush3.bf16.msra.mxu0 %v496_v35  ;;  %p569_p3 = pnand %p568_p2, %p562_p13 }
  0x22   : > { %499 = vmatprep.subr.bf16.mxu0 %v498_v36 }
  0x23   : > { %556 = vset.pattern.permute.xlu0 %v624_v3 }
  0x25   : > { %501 = vmatpush3.bf16.msra.mxu0 %v500_v41 }
  0x26   : > { %503 = vmatprep.subr.bf16.mxu0 %v502_v42 }
  0x29   : > { %505 = vmatpush3.bf16.msra.mxu0 %v504_v47 }
  0x2a   : > { %507 = vmatprep.subr.bf16.mxu0 %v506_v48 }
  0x2d   : > { %509 = vmatpush3.bf16.msra.mxu0 %v508_v51 }
  0x99   : > { %v199_v54 = vpop.permute.xlu0 %198  ;;  %v211_v55 = vpop.permute.xlu1 %210 }
  0x9a   : > { %vm212_vm0 = vcmp.eq.s32.totalorder %v211_v55, %v195_v53  ;;  %vm200_vm1 = vcmp.eq.s32.totalorder %v199_v54, %v195_v53  ;;  %vm213_vm5 = vcmp.eq.s32.totalorder %v211_v55, %v196_v56  ;;  %vm201_vm6 = vcmp.eq.s32.totalorder %v199_v54, %v196_v56 }
  0x9e   : > { %v204_v57 = vpop.permute.xlu0 %203 }
  0x9f   : > { %vm205_vm2 = vcmp.eq.s32.totalorder %v204_v57, %v195_v53  ;;  %vm206_vm3 = vcmp.eq.s32.totalorder %v204_v57, %v196_v56 }
  0xa0   : > { %vm207_vm4 = vmor %vm200_vm1, %vm205_vm2 }
  0xa1   : > { %vm214_vm7 = vmor %vm207_vm4, %vm212_vm0 }
  0xa2   : > { %vm208_vm8 = vmor %vm201_vm6, %vm206_vm3 }
  0xa3   : > { %vm215_vm9 = vmor %vm208_vm8, %vm213_vm5 }
  0xa4   : > { %435 = vmatprep.mubr.msk.f32.mxu0 %vm215_vm9, %v626_v58 }
  0xa5   : > { %436 = vmatmul.mubr.msk.f32.vlgmr.msra.gmra.mrb[0].mxu0 %vm214_vm7, %v626_v58 }
 0x178   : > { %v475_v59 = vpop.f32.mrb[0].mxu0 }
 0x179   : > { %v476_v60 = vpop.f32.mrb[1].mxu0 }
 0x17a   : > { %v477_v61 = vadd.f32 %v476_v60, %v475_v59 }
 0x17c   : > { %v323_v62 = vsel %vm322_vm10, %v477_v61, 0.0 }
 0x17d   : > { %324 = vadd.xlane.f32.xlu1 %v323_v62 }
 0x20a   : > { %v325_v63 = vpop.xlane.xlu1 %324 }
 0x20b   : > { %v327_v0 = vmul.f32 0.03125, %v325_v63 }
 0x20d   : > { %v328_v1 = vsub.f32 %v477_v61, %v327_v0 }
 0x20f   : > { %v329_v2 = vmul.f32 %v328_v1, %v328_v1 }
 0x211   : > { %v330_v3 = vsel %vm322_vm10, %v329_v2, 0.0 }
 0x212   : > { %331 = vadd.xlane.f32.xlu0 %v330_v3 }
 0x29f   : > { %v332_v4 = vpop.xlane.xlu0 %331 }
 0x2a0   : > { %v333_v5 = vmul.f32 0.03125, %v332_v4 }
 0x2a2   : > { %v334_v6 = vadd.f32 1e-12, %v333_v5 }
 0x2a4   : > { %557 = vrsqrt.f32 %v334_v6 }
 0x2ae   : > { %v558_v7 = vpop.eup %557 }
 0x2af   : > { %v336_v9 = vmul.f32 %v558_v7, %v328_v1 }
 0x2b1   : > { %v344_v11 = vmul.f32 %v437_v8, %v336_v9 }
 0x2b3   : > { %v352_v12 = vadd.f32 %v438_v10, %v344_v11 }
 0x2b5   : > { %353 = vst.msk [vmem:[%s188_s9] sm:$0xff] %vm322_vm10, %v352_v12 }
 0x2b6   : > { %572 = shalt.err (!%p569_p3)
}
 0x2b7   : > { %s573_s27 = scalar_lea.hbm %s815_s14, 128  ;;  %s577_s30 = scalar_lea.hbm %s862_s4, 256 }
 0x2b8   : > { %p574_p4 = scmp.ne.s32.totalorder %s815_s14, %s573_s27  ;;  %p578_p9 = scmp.lt.u32.totalorder %s815_s14, %s862_s4 }
 0x2b9   : > { %p579_p10 = scmp.lt.u32.totalorder %s577_s30, %s573_s27  ;;  %p581_p12 = scmp.lt.u32.totalorder %s573_s27, %s815_s14 }
 0x2ba   : > { %p575_p7 = pnand %p574_p4, %p691_p5 }
 0x2bb   : > { %p580_p11 = por %p579_p10, %p578_p9 }
 0x2bc   : > { %p576_p8 = pneg %p575_p7 }
 0x2bd   : > { %p582_p13 = por %p581_p12, %p580_p11 }
 0x2bf   : > { %p583_p0 = pnand %p582_p13, %p576_p8 }
 0x2c1   : > { %586 = shalt.err (!%p583_p0)
}
 0x2c2   : > { %510 = dma.vmem_to_hbm [thread:$0]  (%p691_p5), %s817_s10, 128, %s815_s14, %s355_s20  }
 0x2c3 PF: > { %p516_p1 = scmp.ge.s32.totalorder %s621_s18, 2  ;;  %s380_s7 = sand.u32 1, %s609_s15  }
 0x2c4   : > { %s381_s8 = scalar_lea.sflag [#allocation3], %s380_s7 }
 0x2c5   : > { %p513_p2 = pnand %p516_p1, %p695_p6 }
 0x2c7   : > { %604 = dma.done.wait (!%p513_p2), %s381_s8, 128  }
 0x2c8   : > { %606 = vsyncadd (!%p513_p2), %s381_s8, 4294967168  ;;  %p14_p3 = scmp.ge.s32.totalorder %s678_s21, 4   ;;  %s865_s15 = smov %s613_s16 }
 0x2c9   : > { %s866_s16 = smov %s617_s17  ;;  %s867_s17 = smov %s689_s24 }
 0x2ca   : > { %s868_s18 = smov %s678_s21  ;;  %16 = sbr.rel (!%p14_p3) target bundleno = 3 (0x3), region = 71 }
 0x2d1   :  { %386 = vsyncpa [#allocation3], 1 }
 0x2d2   :  { %388 = vsyncpa [#allocation3 + $0x1], 1 }

</bundles_post_ra>
